<compile_context>
chip_gen: v7x
topology: tpu7x:2x2x1
jax: 0.10.0
libtpu: 0.0.40
codegen_flags: <defaults>
</compile_context>

<pallas_src>
import jax
import jax.numpy as jnp
from jax import lax
from jax.experimental import pallas as pl
from jax.experimental.pallas import tpu as pltpu


def _round_up(x, m):
    return ((x + m - 1) // m) * m


# ---------------------------------------------------------------------------
# Kernel: one streamed entity tile -> one (B, tile_e) slab of scores.
# ---------------------------------------------------------------------------
def _nfe1_kernel(c_ref, lhs2_ref, ent_ref, n2_ref, out_ref):
    # c_ref:    (Bp, 1)      f32          resident:  gamma - ||[mu1, sigma1]||^2
    # lhs2_ref: (Bp, 2*dim)  stream-dtype resident:  2 * [mu1, |sigma1|]
    # ent_ref:  (TE, 2*dim)  stream-dtype streamed:  [t_mu, |t_sigma|]
    # n2_ref:   (1,  TE)     f32          streamed:  ||t_mu||^2 + ||t_sigma||^2
    # out_ref:  (Bp, TE)     f32
    dot = lax.dot_general(
        lhs2_ref[...], ent_ref[...],
        dimension_numbers=(((1,), (1,)), ((), ())),   # NT contraction over 2*dim
        preferred_element_type=jnp.float32,
    )
    out_ref[...] = (c_ref[...] + dot - n2_ref[...]).astype(out_ref.dtype)


# ---------------------------------------------------------------------------
# One-time (amortizable) entity-table prep: bf16 copy with |.| applied to the
# sigma half + f32 squared norms.  Recomputed in-wrapper if not supplied.
# ---------------------------------------------------------------------------
def nfe1_prepare_entities(entity_weight, *, dim, stream_dtype=jnp.bfloat16):
    ew = entity_weight.astype(jnp.float32)
    ent_stream = jnp.concatenate(
        [ew[:, :dim], jnp.abs(ew[:, dim:])], axis=-1).astype(stream_dtype)
    ent_n2 = jnp.sum(ew * ew, axis=-1)          # |.| is a no-op under squaring
    return ent_stream, ent_n2


def nfe1_forward(entity_weight, relation_weight, heads, relations, *,
                 dim, gamma, tile_e=4096, stream_dtype=jnp.bfloat16,
                 ent_stream=None, ent_n2=None):
    """Pallas implementation of Model('NFE-1').forward(heads, relations)."""
    num_entity, two_d = entity_weight.shape
    assert two_d == 2 * dim

    # ---- per-table prep (pass ent_stream/ent_n2 to amortize across calls) ----
    if ent_stream is None or ent_n2 is None:
        ent_stream, ent_n2 = nfe1_prepare_entities(
            entity_weight, dim=dim, stream_dtype=stream_dtype)

    # ---- per-batch prep: O(B*dim), plain XLA glue ----
    h = entity_weight[heads].astype(jnp.float32)
    r = relation_weight[relations].astype(jnp.float32)
    h_mu, h_sigma = h[:, :dim], h[:, dim:]
    r_mu, r_sigma = r[:, :dim], r[:, dim:]
    mu1 = r_sigma * h_mu + r_mu
    sigma1 = jnp.abs(r_sigma * h_sigma)
    lhs = jnp.concatenate([mu1, sigma1], axis=-1)                    # (B, 2*dim)
    c = gamma - jnp.sum(lhs * lhs, axis=-1, keepdims=True)           # (B, 1) f32
    lhs2 = (2.0 * lhs).astype(stream_dtype)                          # (B, 2*dim)

    B = lhs.shape[0]
    b_pad = _round_up(max(B, 1), 8)                 # f32 sublane granule
    if b_pad != B:
        lhs2 = jnp.pad(lhs2, ((0, b_pad - B), (0, 0)))
        c = jnp.pad(c, ((0, b_pad - B), (0, 0)))

    # ---- entity tile sizing: amortize per-step overhead, stay inside scoped
    #      VMEM on every generation (v7x: 64 MiB physical, 32 MiB default). ----
    sbytes = jnp.dtype(stream_dtype).itemsize
    tile = min(int(tile_e), _round_up(num_entity, 128))
    tile = max(128, _round_up(tile, 128))
    budget = 24 * 1024 * 1024                       # double-buffered block budget

    def _blocks_bytes(t):
        return 2 * (t * two_d * sbytes + t * 4 + b_pad * t * 4)

    while _blocks_bytes(tile) > budget and tile > 128:
        tile = max(128, _round_up(tile // 2, 128))

    ne_pad = _round_up(num_entity, tile)
    ent_s = ent_stream.astype(stream_dtype)
    n2 = ent_n2.reshape(1, num_entity).astype(jnp.float32)
    if ne_pad != num_entity:
        ent_s = jnp.pad(ent_s, ((0, ne_pad - num_entity), (0, 0)))
        n2 = jnp.pad(n2, ((0, 0), (0, ne_pad - num_entity)))

    grid = (ne_pad // tile,)
    resident_bytes = 2 * (b_pad * two_d * sbytes + b_pad * 4)
    vmem_limit = int(min(32 * 1024 * 1024,
                         max(16 * 1024 * 1024,
                             _blocks_bytes(tile) + resident_bytes + 4 * 1024 * 1024)))

    cost = pl.CostEstimate(
        flops=2 * b_pad * ne_pad * two_d,
        transcendentals=0,
        bytes_accessed=(ne_pad * two_d * sbytes            # entity stream
                        + ne_pad * 4                       # entity norms
                        + b_pad * ne_pad * 4               # output
                        + b_pad * (two_d * sbytes + 4)),   # resident lhs / c
    )

    out = pl.pallas_call(
        _nfe1_kernel,
        out_shape=jax.ShapeDtypeStruct((b_pad, ne_pad), jnp.float32),
        grid_spec=pltpu.PrefetchScalarGridSpec(
            num_scalar_prefetch=0,
            grid=grid,
            in_specs=[
                pl.BlockSpec((b_pad, 1), lambda e: (0, 0)),       # c (resident)
                pl.BlockSpec((b_pad, two_d), lambda e: (0, 0)),   # 2*lhs (resident)
                pl.BlockSpec((tile, two_d), lambda e: (e, 0)),    # entity tile (streamed)
                pl.BlockSpec((1, tile), lambda e: (0, e)),        # entity norms (streamed)
            ],
            out_specs=pl.BlockSpec((b_pad, tile), lambda e: (0, e)),
        ),
        compiler_params=pltpu.CompilerParams(
            dimension_semantics=("parallel",),   # entity loop shards across TCs on v7x
            vmem_limit_bytes=vmem_limit),
        cost_estimate=cost,
    )(c, lhs2, ent_s, n2)

    return out[:B, :num_entity]


# ---------------------------------------------------------------------------
# References
# ---------------------------------------------------------------------------
def nfe1_reference(entity_weight, relation_weight, heads, relations, *, dim, gamma):
    """Pure-f32 reference matching the PyTorch module semantics."""
    hp = lax.Precision.HIGHEST
    ew = entity_weight.astype(jnp.float32)
    h = ew[heads]
    r = relation_weight.astype(jnp.float32)[relations]
    h_mu, h_sigma = h[:, :dim], h[:, dim:]
    r_mu, r_sigma = r[:, :dim], r[:, dim:]
    t_mu, t_sigma = ew[:, :dim], ew[:, dim:]
    mu1 = r_sigma * h_mu + r_mu
    sigma1 = jnp.abs(r_sigma * h_sigma)
    sigma2 = jnp.abs(t_sigma)
    score = (-2.0 * jnp.dot(mu1, t_mu.T, precision=hp)
             + jnp.sum(mu1 ** 2, -1)[:, None] + jnp.sum(t_mu ** 2, -1)[None, :])
    score = score + (-2.0 * jnp.dot(sigma1, sigma2.T, precision=hp)
                     + jnp.sum(sigma1 ** 2, -1)[:, None]
                     + jnp.sum(sigma2 ** 2, -1)[None, :])
    return gamma - score


def nfe1_reference_quantized(entity_weight, relation_weight, heads, relations, *,
                             dim, gamma, stream_dtype=jnp.bfloat16):
    """Reference applying the same operand rounding the streaming kernel uses."""
    hp = lax.Precision.HIGHEST
    ew = entity_weight.astype(jnp.float32)
    h = ew[heads]
    r = relation_weight.astype(jnp.float32)[relations]
    h_mu, h_sigma = h[:, :dim], h[:, dim:]
    r_mu, r_sigma = r[:, :dim], r[:, dim:]
    mu1 = r_sigma * h_mu + r_mu
    sigma1 = jnp.abs(r_sigma * h_sigma)
    lhs = jnp.concatenate([mu1, sigma1], axis=-1)
    c = gamma - jnp.sum(lhs * lhs, axis=-1, keepdims=True)
    lhs2_q = (2.0 * lhs).astype(stream_dtype).astype(jnp.float32)
    ent_q = jnp.concatenate([ew[:, :dim], jnp.abs(ew[:, dim:])],
                            axis=-1).astype(stream_dtype).astype(jnp.float32)
    n2 = jnp.sum(ew * ew, axis=-1)[None, :]
    return c + jnp.dot(lhs2_q, ent_q.T, precision=hp) - n2


if __name__ == "__main__":
    # Small, deterministic setup (mirrors nn.init.uniform_(-0.1, 0.1)).
    num_entity, num_relation, dim, gamma = 256, 16, 128, 12.0
    batch = 8

    key = jax.random.PRNGKey(0)
    k_ent, k_rel, k_h, k_r = jax.random.split(key, 4)
    entity_weight = jax.random.uniform(
        k_ent, (num_entity, 2 * dim), jnp.float32, minval=-0.1, maxval=0.1)
    relation_weight = jax.random.uniform(
        k_rel, (num_relation, 2 * dim), jnp.float32, minval=-0.1, maxval=0.1)
    heads = jax.random.randint(k_h, (batch,), 0, num_entity, dtype=jnp.int32)
    relations = jax.random.randint(k_r, (batch,), 0, num_relation, dtype=jnp.int32)

    # Default path: bf16-streamed entity table (HBM-bound => ~2x fewer bytes).
    out_bf16 = nfe1_forward(entity_weight, relation_weight, heads, relations,
                            dim=dim, gamma=gamma)
    out_bf16 = jax.block_until_ready(out_bf16)
    assert out_bf16.shape == (batch, num_entity)

    ref_f32 = nfe1_reference(entity_weight, relation_weight, heads, relations,
                             dim=dim, gamma=gamma)
    ref_q = nfe1_reference_quantized(entity_weight, relation_weight, heads,
                                     relations, dim=dim, gamma=gamma)

    # Tight structural check vs a reference with identical bf16 operand rounding.
    err_q = float(jnp.max(jnp.abs(out_bf16 - ref_q)))
    assert jnp.allclose(out_bf16, ref_q, rtol=1e-5, atol=1e-4), (
        f"bf16 kernel mismatch vs bf16-rounded reference: {err_q}")
    # Looser check vs pure-f32 module semantics (bf16 streaming tolerance).
    err_f = float(jnp.max(jnp.abs(out_bf16 - ref_f32)))
    assert err_f < 5e-3, f"bf16 kernel too far from f32 reference: {err_f}"

    # f32 streaming path (same kernel) vs the f32 module-semantics reference.
    out_f32 = nfe1_forward(entity_weight, relation_weight, heads, relations,
                           dim=dim, gamma=gamma, stream_dtype=jnp.float32)
    out_f32 = jax.block_until_ready(out_f32)
    err32 = float(jnp.max(jnp.abs(out_f32 - ref_f32)))
    assert err32 < 5e-3, f"f32 kernel mismatch vs f32 reference: {err32}"

    print("KERNEL_OK")
</pallas_src>

<mosaic_0001>
module attributes {stable_mosaic.version = 11 : i64} {
  func.func @_nfe1_kernel(%arg0: i32, %arg1: memref<8x1xf32, #tpu.memory_space<vmem>>, %arg2: memref<8x256xbf16, #tpu.memory_space<vmem>>, %arg3: memref<256x256xbf16, #tpu.memory_space<vmem>>, %arg4: memref<1x256xf32, #tpu.memory_space<vmem>>, %arg5: memref<8x256xf32, #tpu.memory_space<vmem>>) attributes {dimension_semantics = [#tpu.dimension_semantics<parallel>], iteration_bounds = array<i64: 1>, scalar_prefetch = 0 : i64, scratch_operands = 0 : i64, tpu.core_type = #tpu.core_type<tc>, window_params = [{pipeline_mode = #tpu.pipeline_mode<synchronous>, transform_indices = @transform_0, window_bounds = array<i64: 8, 1>}, {pipeline_mode = #tpu.pipeline_mode<synchronous>, transform_indices = @transform_1, window_bounds = array<i64: 8, 256>}, {transform_indices = @transform_2, window_bounds = array<i64: 256, 256>}, {transform_indices = @transform_3, window_bounds = array<i64: 1, 256>}, {transform_indices = @transform_4, window_bounds = array<i64: 8, 256>}]} {
    %c0 = arith.constant 0 : index
    %c0_0 = arith.constant 0 : index
    %0 = vector.load %arg2[%c0, %c0_0] : memref<8x256xbf16, #tpu.memory_space<vmem>>, vector<8x256xbf16>
    %c0_1 = arith.constant 0 : index
    %c0_2 = arith.constant 0 : index
    %1 = vector.load %arg3[%c0_1, %c0_2] : memref<256x256xbf16, #tpu.memory_space<vmem>>, vector<256x256xbf16>
    %cst = arith.constant dense<0.000000e+00> : vector<8x256xf32>
    %2 = tpu.matmul %0, %1, %cst {dimension_numbers = #tpu.dot_dimension_numbers<[1], [1], [0], [0], [0, 0, 1, 0], [], []>} : vector<8x256xbf16>, vector<256x256xbf16>, vector<8x256xf32> -> vector<8x256xf32>
    %c0_3 = arith.constant 0 : index
    %c0_4 = arith.constant 0 : index
    %3 = vector.load %arg1[%c0_3, %c0_4] : memref<8x1xf32, #tpu.memory_space<vmem>>, vector<8x1xf32>
    %4 = vector.broadcast %3 : vector<8x1xf32> to vector<8x256xf32>
    %5 = arith.addf %4, %2 : vector<8x256xf32>
    %c0_5 = arith.constant 0 : index
    %c0_6 = arith.constant 0 : index
    %6 = vector.load %arg4[%c0_5, %c0_6] : memref<1x256xf32, #tpu.memory_space<vmem>>, vector<1x256xf32>
    %7 = vector.broadcast %6 : vector<1x256xf32> to vector<8x256xf32>
    %8 = arith.subf %5, %7 : vector<8x256xf32>
    %c0_7 = arith.constant 0 : index
    %c0_8 = arith.constant 0 : index
    %9 = vector.load %arg5[%c0_7, %c0_8] : memref<8x256xf32, #tpu.memory_space<vmem>>, vector<8x256xf32>
    tpu.vector_store %arg5[%c0_7, %c0_8], %8 {strides = array<i32>} : memref<8x256xf32, #tpu.memory_space<vmem>>, vector<8x256xf32>,
    return
  }
  func.func @transform_0(%arg0: i32) -> (i32, i32) {
    %c0_i32 = arith.constant 0 : i32
    %c0_i32_0 = arith.constant 0 : i32
    %c0_i32_1 = arith.constant 0 : i32
    return %c0_i32, %c0_i32_0 : i32, i32
  }
  func.func @transform_1(%arg0: i32) -> (i32, i32) {
    %c0_i32 = arith.constant 0 : i32
    %c0_i32_0 = arith.constant 0 : i32
    %c0_i32_1 = arith.constant 0 : i32
    return %c0_i32, %c0_i32_0 : i32, i32
  }
  func.func @transform_2(%arg0: i32) -> (i32, i32) {
    %c0_i32 = arith.constant 0 : i32
    %c0_i32_0 = arith.constant 0 : i32
    return %arg0, %c0_i32 : i32, i32
  }
  func.func @transform_3(%arg0: i32) -> (i32, i32) {
    %c0_i32 = arith.constant 0 : i32
    %c0_i32_0 = arith.constant 0 : i32
    return %c0_i32, %arg0 : i32, i32
  }
  func.func @transform_4(%arg0: i32) -> (i32, i32) {
    %c0_i32 = arith.constant 0 : i32
    %c0_i32_0 = arith.constant 0 : i32
    return %c0_i32, %arg0 : i32, i32
  }
}

</mosaic_0001>

<bundles_post_ra>
// kernel: tpu_custom_call.1
= control target key start
LH: loop header
LB: loop body
LE: loop exit
PB: predicated region body
PF: predicated region fallthrough
CT: control target
= control target key end

     0   :  { %9 = vsyncpa [#allocation3], 0  ;;  %s513_s0 = inlined_call_operand.vmem [shape: f32[8,1], index: 0, kind: input, shape index: {}]   ;;  %s514_s1 = inlined_call_operand.vmem [shape: bf16[8,256], index: 1, kind: input, shape index: {}]   ;;  %s515_s2 = inlined_call_operand.hbm [shape: bf16[256,256], index: 2, kind: input, shape index: {}]   ;;  %s516_s3 = inlined_call_operand.vmem [shape: f32[1,256], index: 3, kind: input, shape index: {}]   ;;  %s517_s4 = inlined_call_operand.hbm [shape: f32[8,256], index: 4, kind: output, shape index: {}]  }
   0x1   :  { %10 = vsyncpa [#allocation4], 0  ;;  %s450_s15 = smov [#allocation2]   ;;  %s402_s19 = scalar_lea.hbm %s515_s2, 4096 }
   0x2   :  { %s20_s16 = sshll.u32 %s450_s15, 4  ;;  %p403_p0 = scmp.ne.s32.totalorder %s515_s2, %s402_s19  ;;  %s21_s16 = int_to_ptr.vmem [resolvable:$true] %s20_s16 }
   0x3   :  { %p406_p1 = scmp.lt.u32.totalorder %s402_s19, %s515_s2 }
   0x5   :  { %p408_p2 = pnand %p406_p1, %p403_p0 }
   0x7   :  { %411 = shalt.err (!%p408_p2)
}
   0x8   :  { %s412_s24 = scalar_lea.vmem %s21_s16, 4096  ;;  %p417_p4 = scmp.lt.s32.totalorder %s21_s16, %s21_s16 }
   0x9   :  { %p413_p3 = scmp.ne.s32.totalorder %s21_s16, %s412_s24  ;;  %p418_p5 = scmp.lt.s32.totalorder %s412_s24, %s412_s24 }
   0xb   :  { %p419_p6 = por %p418_p5, %p417_p4 }
   0xd   :  { %p420_p7 = pnand %p419_p6, %p413_p3 }
   0xf   :  { %423 = shalt.err (!%p420_p7)
}
  0x10   :  { %s451_s25 = smov 128   ;;  %s452_s26 = smov 8  }
  0x11   :  { %26 = dma.hbm_to_vmem [thread:$0]  %s515_s2, 4096, %s21_s16, [#allocation3], %s451_s25, %s451_s25, %s452_s26  }
  0x12   :  { %446 = dma.done.wait [#allocation3], 4096  }
  0x13   :  { %447 = vsyncadd [#allocation3], 4294963200  ;;  %v352_v0 = vld [vmem:[#allocation2 + $0x4] ss:$8 sps:$4 sm:$0xff]   ;;  %v354_v1 = vld [vmem:[#allocation2] ss:$8 sps:$4 sm:$0xff]   ;;  %v283_v37 = vlaneseq }
  0x14   :  { %232 = vmatprep.subr.bf16.mxu0 %v352_v0  ;;  %v355_v2 = vld [vmem:[#allocation2 + $0x14] ss:$8 sps:$4 sm:$0xff]   ;;  %v453_v3 = vmov 0   ;;  %v357_v4 = vld [vmem:[#allocation2 + $0x10] ss:$8 sps:$4 sm:$0xff]   ;;  %v32_v8 = vld [vmem:[%s514_s1] sm:$0xff] }
  0x15   :  { %233 = vmatpush1.bf16.xpose.msra.mxu0 %v354_v1  ;;  %351 = vset.pattern.permute.xlu0 %v453_v3  ;;  %v358_v5 = vld [vmem:[#allocation2 + $0x24] ss:$8 sps:$4 sm:$0xff]   ;;  %v360_v6 = vld [vmem:[#allocation2 + $0x20] ss:$8 sps:$4 sm:$0xff]   ;;  %v361_v7 = vld [vmem:[#allocation2 + $0x34] ss:$8 sps:$4 sm:$0xff]   ;;  %v313_v10 = vcombine.high %v32_v8, %v32_v8  ;;  %v312_v36 = vcombine.low %v32_v8, %v32_v8 }
  0x16   :  { %234 = vmatprep.subr.bf16.mxu0 %v355_v2  ;;  %v273_v9 = vld [vmem:[%s513_s0] sm:$0xff]  ;;  %v363_v11 = vld [vmem:[#allocation2 + $0x30] ss:$8 sps:$4 sm:$0xff]   ;;  %v367_v14 = vld [vmem:[#allocation2 + $0x54] ss:$8 sps:$4 sm:$0xff]   ;;  %v284_v38 = vshrl.u32 %v283_v37, 7 }
  0x17   :  { %276 = vperm.xlu0 %351, %v273_v9   ;;  %v364_v12 = vld [vmem:[#allocation2 + $0x44] ss:$8 sps:$4 sm:$0xff]   ;;  %264 = vmatprep.mubr.bf16.mxu0 %v313_v10  ;;  %v366_v13 = vld [vmem:[#allocation2 + $0x40] ss:$8 sps:$4 sm:$0xff]   ;;  %v369_v15 = vld [vmem:[#allocation2 + $0x50] ss:$8 sps:$4 sm:$0xff]  }
  0x18   :  { %v370_v16 = vld [vmem:[#allocation2 + $0x64] ss:$8 sps:$4 sm:$0xff]   ;;  %v372_v17 = vld [vmem:[#allocation2 + $0x60] ss:$8 sps:$4 sm:$0xff]   ;;  %v373_v18 = vld [vmem:[#allocation2 + $0x74] ss:$8 sps:$4 sm:$0xff]  }
  0x19   :  { %v375_v19 = vld [vmem:[#allocation2 + $0x70] ss:$8 sps:$4 sm:$0xff]   ;;  %v376_v20 = vld [vmem:[#allocation2 + $0x84] ss:$8 sps:$4 sm:$0xff]   ;;  %v378_v21 = vld [vmem:[#allocation2 + $0x80] ss:$8 sps:$4 sm:$0xff]  }
  0x1a   :  { %v379_v22 = vld [vmem:[#allocation2 + $0x94] ss:$8 sps:$4 sm:$0xff]   ;;  %v381_v23 = vld [vmem:[#allocation2 + $0x90] ss:$8 sps:$4 sm:$0xff]   ;;  %v382_v24 = vld [vmem:[#allocation2 + $0xa4] ss:$8 sps:$4 sm:$0xff]  }
  0x1b   :  { %v384_v25 = vld [vmem:[#allocation2 + $0xa0] ss:$8 sps:$4 sm:$0xff]   ;;  %v385_v26 = vld [vmem:[#allocation2 + $0xb4] ss:$8 sps:$4 sm:$0xff]   ;;  %v387_v27 = vld [vmem:[#allocation2 + $0xb0] ss:$8 sps:$4 sm:$0xff]  }
  0x1c   :  { %v388_v28 = vld [vmem:[#allocation2 + $0xc4] ss:$8 sps:$4 sm:$0xff]   ;;  %v390_v29 = vld [vmem:[#allocation2 + $0xc0] ss:$8 sps:$4 sm:$0xff]   ;;  %v391_v30 = vld [vmem:[#allocation2 + $0xd4] ss:$8 sps:$4 sm:$0xff]  }
  0x1d   :  { %235 = vmatpush1.bf16.xpose.msra.mxu0 %v357_v4  ;;  %v393_v31 = vld [vmem:[#allocation2 + $0xd0] ss:$8 sps:$4 sm:$0xff]   ;;  %v394_v32 = vld [vmem:[#allocation2 + $0xe4] ss:$8 sps:$4 sm:$0xff]   ;;  %v396_v33 = vld [vmem:[#allocation2 + $0xe0] ss:$8 sps:$4 sm:$0xff]  }
  0x1e   :  { %236 = vmatprep.subr.bf16.mxu0 %v358_v5  ;;  %v397_v34 = vld [vmem:[#allocation2 + $0xf4] ss:$8 sps:$4 sm:$0xff]   ;;  %v399_v35 = vld [vmem:[#allocation2 + $0xf0] ss:$8 sps:$4 sm:$0xff]   ;;  %v285_v39 = vsub.s32 0, %v284_v38  ;;  %v289_v41 = vsub.s32 1, %v284_v38 }
  0x1f   :  { %v281_v40 = vld [vmem:[%s516_s3] sm:$0x3]  ;;  %s454_s6 = smov [#allocation5]  }
  0x20   :  { %v286_v43 = vrot.slane %v281_v40, %v285_v39  ;;  %v290_v45 = vrot.slane %v281_v40, %v289_v41  ;;  %s303_s7 = sshll.u32 %s454_s6, 4  ;;  %s304_s7 = int_to_ptr.vmem [resolvable:$true] %s303_s7 }
  0x21   :  { %s424_s8 = scalar_lea.vmem %s304_s7, 256  ;;  %p429_p9 = scmp.lt.s32.totalorder %s304_s7, %s304_s7 }
  0x22   :  { %p425_p8 = scmp.ne.s32.totalorder %s304_s7, %s424_s8  ;;  %p430_p10 = scmp.lt.s32.totalorder %s424_s8, %s424_s8 }
  0x24   :  { %p431_p11 = por %p430_p10, %p429_p9 }
  0x25   :  { %237 = vmatpush1.bf16.xpose.msra.mxu0 %v360_v6 }
  0x26   :  { %238 = vmatprep.subr.bf16.mxu0 %v361_v7  ;;  %p432_p12 = pnand %p431_p11, %p425_p8 }
  0x2d   :  { %239 = vmatpush1.bf16.xpose.msra.mxu0 %v363_v11 }
  0x2e   :  { %240 = vmatprep.subr.bf16.mxu0 %v364_v12 }
  0x35   :  { %241 = vmatpush1.bf16.xpose.msra.mxu0 %v366_v13 }
  0x36   :  { %242 = vmatprep.subr.bf16.mxu0 %v367_v14 }
  0x3d   :  { %243 = vmatpush1.bf16.xpose.msra.mxu0 %v369_v15 }
  0x3e   :  { %244 = vmatprep.subr.bf16.mxu0 %v370_v16 }
  0x45   :  { %245 = vmatpush1.bf16.xpose.msra.mxu0 %v372_v17 }
  0x46   :  { %246 = vmatprep.subr.bf16.mxu0 %v373_v18 }
  0x4d   :  { %247 = vmatpush1.bf16.xpose.msra.mxu0 %v375_v19 }
  0x4e   :  { %248 = vmatprep.subr.bf16.mxu0 %v376_v20 }
  0x55   :  { %249 = vmatpush1.bf16.xpose.msra.mxu0 %v378_v21 }
  0x56   :  { %250 = vmatprep.subr.bf16.mxu0 %v379_v22 }
  0x5d   :  { %251 = vmatpush1.bf16.xpose.msra.mxu0 %v381_v23 }
  0x5e   :  { %252 = vmatprep.subr.bf16.mxu0 %v382_v24 }
  0x65   :  { %253 = vmatpush1.bf16.xpose.msra.mxu0 %v384_v25 }
  0x66   :  { %254 = vmatprep.subr.bf16.mxu0 %v385_v26 }
  0x6d   :  { %255 = vmatpush1.bf16.xpose.msra.mxu0 %v387_v27 }
  0x6e   :  { %256 = vmatprep.subr.bf16.mxu0 %v388_v28 }
  0x75   :  { %257 = vmatpush1.bf16.xpose.msra.mxu0 %v390_v29 }
  0x76   :  { %258 = vmatprep.subr.bf16.mxu0 %v391_v30 }
  0x7d   :  { %259 = vmatpush1.bf16.xpose.msra.mxu0 %v393_v31 }
  0x7e   :  { %260 = vmatprep.subr.bf16.mxu0 %v394_v32 }
  0x85   :  { %261 = vmatpush1.bf16.xpose.msra.mxu0 %v396_v33 }
  0x86   :  { %262 = vmatprep.subr.bf16.mxu0 %v397_v34 }
  0x8d   :  { %263 = vmatpush1.bf16.xpose.msra.mxu0 %v399_v35 }
  0x94   :  { %265 = vmatmul.mubr.bf16.vlgmr.msra.gmra.mrb[0].mxu0 %v312_v36 }
  0x96   :  { %v277_v42 = vpop.permute.xlu0 %276 }
 0x167   :  { %v266_v44 = vpop.f32.mrb[0].mxu0 }
 0x168   :  { %v279_v46 = vadd.f32 %v277_v42, %v266_v44  ;;  %v268_v47 = vpop.f32.mrb[1].mxu0 }
 0x169   :  { %v280_v48 = vadd.f32 %v277_v42, %v268_v47  ;;  %v270_v49 = vpop.f32.mrb[2].mxu0 }
 0x16a   :  { %v293_v50 = vsub.f32 %v279_v46, %v286_v43  ;;  %v271_v51 = vpop.f32.mrb[3].mxu0 }
 0x16b   :  { %v294_v52 = vsub.f32 %v280_v48, %v290_v45 }
 0x16c   :  { %295 = vst [vmem:[#allocation5] sm:$0xff] %v293_v50 }
 0x16d   :  { %296 = vst [vmem:[#allocation5 + $0x8] sm:$0xff] %v294_v52 }
 0x16e   :  { %435 = shalt.err (!%p432_p12)
}
 0x16f   :  { %s436_s10 = scalar_lea.hbm %s517_s4, 256 }
 0x170   :  { %p437_p13 = scmp.ne.s32.totalorder %s517_s4, %s436_s10  ;;  %p440_p0 = scmp.lt.u32.totalorder %s436_s10, %s517_s4 }
 0x172   :  { %p442_p1 = pnand %p440_p0, %p437_p13 }
 0x174   :  { %445 = shalt.err (!%p442_p1)
}
 0x175   :  { %306 = dma.vmem_to_hbm [thread:$0]  %s304_s7, 256, %s517_s4, [#allocation4]  }
 0x176   :  { %448 = dma.done.wait [#allocation4], 256  }
 0x177   :  { %449 = vsyncadd [#allocation4], 4294967040 }
 0x178   :  { %310 = vsyncpa [#allocation3], 1 }
 0x179   :  { %311 = vsyncpa [#allocation4], 1 }

</bundles_post_ra>
